<compile_context>
chip_gen: v6e
topology: v6e:2x2x1
jax: 0.10.0
libtpu: 0.0.40
codegen_flags: <defaults>
</compile_context>

<pallas_src>
import functools

import jax
import jax.numpy as jnp
from jax.experimental import pallas as pl
from jax.experimental.pallas import tpu as pltpu


def _round_up(x: int, m: int) -> int:
    return ((x + m - 1) // m) * m


def _mlp_kernel(x_ref, w1_ref, b1_ref, w2_ref, b2_ref, o_ref):
    # fc1: (TB, D)bf16 @ (D, H)bf16 -> f32 accumulator on the MXU.
    h = jnp.dot(x_ref[...], w1_ref[...], preferred_element_type=jnp.float32)
    # Bias add + ReLU on the f32 accumulator (f32 VPU path).
    h = jnp.maximum(h + b1_ref[...], 0.0)
    # fc2: (TB, H)bf16 @ (H, C_pad)bf16 -> f32 accumulator on the MXU.
    o = jnp.dot(h.astype(w2_ref.dtype), w2_ref[...],
                preferred_element_type=jnp.float32)
    # Lane-dense (TB, 128) store, unmasked.
    o_ref[...] = (o + b2_ref[...]).astype(o_ref.dtype)


@functools.partial(jax.jit, static_argnames=("tile_b",))
def tweet_classifier_forward(x, w1, b1, w2, b2, *, tile_b=1024):
    """x: (B, input_dim) f32; w1: (input_dim, hidden); b1: (hidden,);
       w2: (hidden, num_classes); b2: (num_classes,).
       Weights are stored pre-transposed (in, out) relative to torch's (out, in).
       Returns (B, num_classes) in x.dtype."""
    B, D = x.shape
    H = w1.shape[1]
    C = w2.shape[1]

    compute_dtype = jnp.bfloat16
    lane = 128
    C_pad = _round_up(max(C, lane), lane)

    # --- wrapper-side operand prep -------------------------------------------
    # bf16 MXU operands; biases stay f32 (added on the f32 accumulator).
    x_c = x.astype(compute_dtype)
    w1_c = w1.astype(compute_dtype)
    w2_p = jnp.zeros((H, C_pad), compute_dtype).at[:, :C].set(
        w2.astype(compute_dtype))
    b1_row = b1.astype(jnp.float32).reshape(1, H)
    b2_row = jnp.zeros((1, C_pad), jnp.float32).at[:, :C].set(
        b2.astype(jnp.float32))

    # Batch tiling: TILE_B multiple of 8, pad B up to a multiple of TILE_B.
    tb = min(max(tile_b, 8), _round_up(B, 8))
    tb = _round_up(tb, 8)
    B_pad = _round_up(B, tb)
    if B_pad != B:
        x_c = jnp.pad(x_c, ((0, B_pad - B), (0, 0)))

    grid = (B_pad // tb,)

    itemsize = jnp.dtype(compute_dtype).itemsize
    cost = pl.CostEstimate(
        flops=2 * B_pad * (D * H + H * C_pad),
        transcendentals=0,
        bytes_accessed=(B_pad * D * itemsize                   # x
                        + D * H * itemsize                     # w1 (resident)
                        + H * C_pad * itemsize                 # w2 (resident)
                        + (H + C_pad) * 4                      # biases
                        + B_pad * C_pad * x.dtype.itemsize),   # out
    )

    out_padded = pl.pallas_call(
        _mlp_kernel,
        out_shape=jax.ShapeDtypeStruct((B_pad, C_pad), x.dtype),
        grid=grid,
        in_specs=[
            pl.BlockSpec((tb, D), lambda i: (i, 0)),       # x: batch-tiled
            pl.BlockSpec((D, H), lambda i: (0, 0)),        # w1: resident
            pl.BlockSpec((1, H), lambda i: (0, 0)),        # b1: resident
            pl.BlockSpec((H, C_pad), lambda i: (0, 0)),    # w2: resident
            pl.BlockSpec((1, C_pad), lambda i: (0, 0)),    # b2: resident
        ],
        out_specs=pl.BlockSpec((tb, C_pad), lambda i: (i, 0)),
        compiler_params=pltpu.CompilerParams(
            dimension_semantics=("parallel",)),
        cost_estimate=cost,
    )(x_c, w1_c, b1_row, w2_p, b2_row)

    return out_padded[:B, :C]


def init_params(key, input_dim, num_classes, hidden_dim=128, dtype=jnp.float32):
    """Deterministic init mimicking torch.nn.Linear's U(-1/sqrt(fan_in), 1/sqrt(fan_in))."""
    k1, k2, k3, k4 = jax.random.split(key, 4)
    bound1 = 1.0 / jnp.sqrt(input_dim)
    bound2 = 1.0 / jnp.sqrt(hidden_dim)
    # Stored as (in, out) == torch weight (out, in) transposed.
    w1 = jax.random.uniform(k1, (input_dim, hidden_dim), dtype, -bound1, bound1)
    b1 = jax.random.uniform(k2, (hidden_dim,), dtype, -bound1, bound1)
    w2 = jax.random.uniform(k3, (hidden_dim, num_classes), dtype, -bound2, bound2)
    b2 = jax.random.uniform(k4, (num_classes,), dtype, -bound2, bound2)
    return w1, b1, w2, b2


if __name__ == "__main__":
    key = jax.random.PRNGKey(0)
    batch = 8
    input_dim = 32
    hidden_dim = 128
    num_classes = 4

    kx, kp = jax.random.split(key)
    x = jax.random.normal(kx, (batch, input_dim), jnp.float32)
    w1, b1, w2, b2 = init_params(kp, input_dim, num_classes, hidden_dim)

    out = tweet_classifier_forward(x, w1, b1, w2, b2)
    out = jax.block_until_ready(out)
    assert out.shape == (batch, num_classes)

    # Reference with matching bf16 MXU operands / f32 accumulation.
    h_ref = jnp.dot(x.astype(jnp.bfloat16), w1.astype(jnp.bfloat16),
                    preferred_element_type=jnp.float32)
    h_ref = jnp.maximum(h_ref + b1, 0.0)
    ref_bf16 = jnp.dot(h_ref.astype(jnp.bfloat16), w2.astype(jnp.bfloat16),
                       preferred_element_type=jnp.float32) + b2
    assert jnp.allclose(out, ref_bf16, atol=1e-3, rtol=1e-3)

    # Loose check against the pure-f32 math of the torch module.
    ref_f32 = jnp.maximum(x @ w1 + b1, 0.0) @ w2 + b2
    assert jnp.allclose(out, ref_f32, atol=5e-2, rtol=5e-2)

    print("KERNEL_OK")
</pallas_src>

<mosaic_0001>
module attributes {stable_mosaic.version = 11 : i64} {
  func.func @_mlp_kernel(%arg0: i32, %arg1: memref<8x32xbf16, #tpu.memory_space<vmem>>, %arg2: memref<32x128xbf16, #tpu.memory_space<vmem>>, %arg3: memref<1x128xf32, #tpu.memory_space<vmem>>, %arg4: memref<128x128xbf16, #tpu.memory_space<vmem>>, %arg5: memref<1x128xf32, #tpu.memory_space<vmem>>, %arg6: memref<8x128xf32, #tpu.memory_space<vmem>>) attributes {dimension_semantics = [#tpu.dimension_semantics<parallel>], iteration_bounds = array<i64: 1>, scalar_prefetch = 0 : i64, scratch_operands = 0 : i64, tpu.core_type = #tpu.core_type<tc>, window_params = [{transform_indices = @transform_0, window_bounds = array<i64: 8, 32>}, {pipeline_mode = #tpu.pipeline_mode<synchronous>, transform_indices = @transform_1, window_bounds = array<i64: 32, 128>}, {pipeline_mode = #tpu.pipeline_mode<synchronous>, transform_indices = @transform_2, window_bounds = array<i64: 1, 128>}, {pipeline_mode = #tpu.pipeline_mode<synchronous>, transform_indices = @transform_3, window_bounds = array<i64: 128, 128>}, {pipeline_mode = #tpu.pipeline_mode<synchronous>, transform_indices = @transform_4, window_bounds = array<i64: 1, 128>}, {transform_indices = @transform_5, window_bounds = array<i64: 8, 128>}]} {
    %c0 = arith.constant 0 : index
    %c0_0 = arith.constant 0 : index
    %0 = vector.load %arg1[%c0, %c0_0] : memref<8x32xbf16, #tpu.memory_space<vmem>>, vector<8x32xbf16>
    %c0_1 = arith.constant 0 : index
    %c0_2 = arith.constant 0 : index
    %1 = vector.load %arg2[%c0_1, %c0_2] : memref<32x128xbf16, #tpu.memory_space<vmem>>, vector<32x128xbf16>
    %cst = arith.constant dense<0.000000e+00> : vector<8x128xf32>
    %2 = tpu.matmul %0, %1, %cst {dimension_numbers = #tpu.dot_dimension_numbers<[1], [0], [0], [1], [0, 0, 1, 1], [], []>} : vector<8x32xbf16>, vector<32x128xbf16>, vector<8x128xf32> -> vector<8x128xf32>
    %c0_3 = arith.constant 0 : index
    %c0_4 = arith.constant 0 : index
    %3 = vector.load %arg3[%c0_3, %c0_4] : memref<1x128xf32, #tpu.memory_space<vmem>>, vector<1x128xf32>
    %4 = vector.broadcast %3 : vector<1x128xf32> to vector<8x128xf32>
    %5 = arith.addf %2, %4 : vector<8x128xf32>
    %cst_5 = arith.constant 0.000000e+00 : f32
    %6 = vector.broadcast %cst_5 : f32 to vector<8x128xf32>
    %7 = arith.maximumf %5, %6 : vector<8x128xf32>
    %8 = arith.truncf %7 : vector<8x128xf32> to vector<8x128xbf16>
    %c0_6 = arith.constant 0 : index
    %c0_7 = arith.constant 0 : index
    %9 = vector.load %arg4[%c0_6, %c0_7] : memref<128x128xbf16, #tpu.memory_space<vmem>>, vector<128x128xbf16>
    %cst_8 = arith.constant dense<0.000000e+00> : vector<8x128xf32>
    %10 = tpu.matmul %8, %9, %cst_8 {dimension_numbers = #tpu.dot_dimension_numbers<[1], [0], [0], [1], [0, 0, 1, 1], [], []>} : vector<8x128xbf16>, vector<128x128xbf16>, vector<8x128xf32> -> vector<8x128xf32>
    %c0_9 = arith.constant 0 : index
    %c0_10 = arith.constant 0 : index
    %11 = vector.load %arg5[%c0_9, %c0_10] : memref<1x128xf32, #tpu.memory_space<vmem>>, vector<1x128xf32>
    %12 = vector.broadcast %11 : vector<1x128xf32> to vector<8x128xf32>
    %13 = arith.addf %10, %12 : vector<8x128xf32>
    %c0_11 = arith.constant 0 : index
    %c0_12 = arith.constant 0 : index
    %14 = vector.load %arg6[%c0_11, %c0_12] : memref<8x128xf32, #tpu.memory_space<vmem>>, vector<8x128xf32>
    tpu.vector_store %arg6[%c0_11, %c0_12], %13 {strides = array<i32>} : memref<8x128xf32, #tpu.memory_space<vmem>>, vector<8x128xf32>,
    return
  }
  func.func @transform_0(%arg0: i32) -> (i32, i32) {
    %c0_i32 = arith.constant 0 : i32
    %c0_i32_0 = arith.constant 0 : i32
    return %arg0, %c0_i32 : i32, i32
  }
  func.func @transform_1(%arg0: i32) -> (i32, i32) {
    %c0_i32 = arith.constant 0 : i32
    %c0_i32_0 = arith.constant 0 : i32
    %c0_i32_1 = arith.constant 0 : i32
    return %c0_i32, %c0_i32_0 : i32, i32
  }
  func.func @transform_2(%arg0: i32) -> (i32, i32) {
    %c0_i32 = arith.constant 0 : i32
    %c0_i32_0 = arith.constant 0 : i32
    %c0_i32_1 = arith.constant 0 : i32
    return %c0_i32, %c0_i32_0 : i32, i32
  }
  func.func @transform_3(%arg0: i32) -> (i32, i32) {
    %c0_i32 = arith.constant 0 : i32
    %c0_i32_0 = arith.constant 0 : i32
    %c0_i32_1 = arith.constant 0 : i32
    return %c0_i32, %c0_i32_0 : i32, i32
  }
  func.func @transform_4(%arg0: i32) -> (i32, i32) {
    %c0_i32 = arith.constant 0 : i32
    %c0_i32_0 = arith.constant 0 : i32
    %c0_i32_1 = arith.constant 0 : i32
    return %c0_i32, %c0_i32_0 : i32, i32
  }
  func.func @transform_5(%arg0: i32) -> (i32, i32) {
    %c0_i32 = arith.constant 0 : i32
    %c0_i32_0 = arith.constant 0 : i32
    return %arg0, %c0_i32 : i32, i32
  }
}

</mosaic_0001>

<bundles_post_ra>
// kernel: tweet_classifier_forward.1
= control target key start
LH: loop header
LB: loop body
LE: loop exit
PB: predicated region body
PF: predicated region fallthrough
CT: control target
= control target key end

     0   :  { %v272_v0 = vmov 0.0   ;;  %vm273_vm0 = vmmov 0   ;;  %vm45_vm1 = vcmask 261120   ;;  %s346_s1 = inlined_call_operand.vmem [shape: bf16[32,128], index: 1, kind: input, shape index: {}]   ;;  %s347_s3 = inlined_call_operand.vmem [shape: bf16[128,128], index: 3, kind: input, shape index: {}]   ;;  %s348_s0 = inlined_call_operand.vmem [shape: bf16[8,32], index: 0, kind: input, shape index: {}]   ;;  %s349_s2 = inlined_call_operand.vmem [shape: f32[1,128], index: 2, kind: input, shape index: {}]   ;;  %s350_s4 = inlined_call_operand.vmem [shape: f32[1,128], index: 4, kind: input, shape index: {}]   ;;  %s351_s5 = inlined_call_operand.vmem [shape: f32[8,128], index: 5, kind: output, shape index: {}]  }
   0x1   :  { %232 = vmatprep.subr.bf16.mxu0 %v272_v0  ;;  %v262_v1 = vld [vmem:[%s346_s1 + $0x8] sm:$0xff]   ;;  %236 = vmatprep.mubr.msk.bf16.mxu0 %vm273_vm0, %v272_v0  ;;  %v263_v2 = vld [vmem:[%s346_s1] sm:$0xff]   ;;  %v264_v3 = vld [vmem:[%s347_s3 + $0x38] sm:$0xff]  }
   0x2   :  { %240 = vmatprep.subr.bf16.mxu1 %v272_v0  ;;  %256 = vmatprep.mubr.msk.bf16.mxu1 %vm273_vm0, %v272_v0  ;;  %v265_v4 = vld [vmem:[%s347_s3 + $0x30] sm:$0xff]   ;;  %v21_v5 = vld [vmem:[%s348_s0] sm:$0xf]  ;;  %v266_v6 = vld [vmem:[%s347_s3 + $0x28] sm:$0xff]  }
   0x3   :  { %233 = vmatpush3.bf16.msra.mxu0 %v262_v1  ;;  %241 = vmatpush3.bf16.msra.mxu1 %v264_v3  ;;  %v267_v7 = vld [vmem:[%s347_s3 + $0x20] sm:$0xff]   ;;  %v268_v8 = vld [vmem:[%s347_s3 + $0x18] sm:$0xff]   ;;  %v269_v9 = vld [vmem:[%s347_s3 + $0x10] sm:$0xff]  }
   0x4   :  { %234 = vmatprep.subr.bf16.mxu0 %v272_v0  ;;  %242 = vmatprep.subr.bf16.mxu1 %v272_v0  ;;  %v270_v10 = vld [vmem:[%s347_s3 + $0x8] sm:$0xff]   ;;  %v271_v11 = vld [vmem:[%s347_s3] sm:$0xff]  }
   0x5   :  { %v207_v12 = vld [vmem:[%s349_s2] ss:$0 sm:$0xff] }
   0x6   :  { %v211_v20 = vld [vmem:[%s350_s4] ss:$0 sm:$0xff] }
   0x7   :  { %235 = vmatpush3.bf16.msra.mxu0 %v263_v2  ;;  %243 = vmatpush3.bf16.msra.mxu1 %v265_v4 }
   0x8   :  { %244 = vmatprep.subr.bf16.mxu1 %v272_v0 }
   0xa   :  { %237 = vmatmul.mubr.msk.bf16.vlgmr.msra.gmra.mxu0 %vm45_vm1, %v21_v5 }
   0xb   :  { %245 = vmatpush3.bf16.msra.mxu1 %v266_v6 }
   0xc   :  { %246 = vmatprep.subr.bf16.mxu1 %v272_v0 }
   0xf   :  { %247 = vmatpush3.bf16.msra.mxu1 %v267_v7 }
  0x10   :  { %248 = vmatprep.subr.bf16.mxu1 %v272_v0 }
  0x13   :  { %249 = vmatpush3.bf16.msra.mxu1 %v268_v8 }
  0x14   :  { %250 = vmatprep.subr.bf16.mxu1 %v272_v0 }
  0x17   :  { %251 = vmatpush3.bf16.msra.mxu1 %v269_v9 }
  0x18   :  { %252 = vmatprep.subr.bf16.mxu1 %v272_v0 }
  0x1b   :  { %253 = vmatpush3.bf16.msra.mxu1 %v270_v10 }
  0x1c   :  { %254 = vmatprep.subr.bf16.mxu1 %v272_v0 }
  0x1f   :  { %255 = vmatpush3.bf16.msra.mxu1 %v271_v11 }
  0xca   :  { %v83_v13 = vpop.f32.mrf.mxu0 }
  0xcb   :  { %v84_v14 = vadd.f32 %v207_v12, %v83_v13 }
  0xcc   :  { %v238_v15 = vpop.f32.mrf.mxu0 }
  0xcd   :  { %v89_v16 = vmax.f32 %v84_v14, 0.0 }
  0xce   :  { %v86_v17 = vpop.f32.mrf.mxu0 }
  0xcf   :  { %v90_v18 = vpack.c.bf16 %v89_v16, %v89_v16 }
  0xd0   :  { %v239_v19 = vpop.f32.mrf.mxu0 }
  0xd1   :  { %257 = vmatmul.mubr.bf16.vlgmr.msra.gmra.mxu1 %v90_v18 }
 0x191   :  { %v196_v21 = vpop.f32.mrf.mxu1 }
 0x192   :  { %v197_v22 = vadd.f32 %v211_v20, %v196_v21 }
 0x193   :  { %v258_v23 = vpop.f32.mrf.mxu1 }
 0x194   :  { %202 = vst [vmem:[%s351_s5] sm:$0xff] %v197_v22 }
 0x195   :  { %v199_v24 = vpop.f32.mrf.mxu1 }
 0x197   :  { %v259_v25 = vpop.f32.mrf.mxu1 }

</bundles_post_ra>
